<compile_context>
chip_gen: v7x
topology: tpu7x:2x2x1
jax: 0.10.0
libtpu: 0.0.40
codegen_flags: <defaults>
</compile_context>

<pallas_src>
import jax
import jax.numpy as jnp
from jax.experimental import pallas as pl
from jax.experimental.pallas import tpu as pltpu

LN_EPS = 1e-5


def _patch_merging_kernel(x_ref, w_ref, b_ref, o_ref):
    # x_ref: (th, 2, W2, 2C)   th row-pairs; [:,0] = even image row slab [x0|x2],
    #                          [:,1] = odd image row slab [x1|x3]
    # w_ref: (2, 2C, 2C) bf16  [W_even; W_odd], rows pre-scaled by permuted gamma
    # b_ref: (1, 2C) f32       folded LayerNorm bias  (beta_perm @ W)
    # o_ref: (th, W2, 2C)
    xb = x_ref[...].astype(jnp.float32)            # (th, 2, W2, 2C)
    th, _, w2, c2 = xb.shape

    even = xb[:, 0, :, :]                          # (th, W2, 2C)  [x0 | x2]
    odd = xb[:, 1, :, :]                           # (th, W2, 2C)  [x1 | x3]

    # One-pass LayerNorm statistics over the full 4C feature vector.
    inv_n = 1.0 / float(2 * c2)                    # 1 / (4C)
    s = (jnp.sum(even, axis=-1, keepdims=True) +
         jnp.sum(odd, axis=-1, keepdims=True))
    sq = (jnp.sum(even * even, axis=-1, keepdims=True) +
          jnp.sum(odd * odd, axis=-1, keepdims=True))
    mean = s * inv_n
    # Clamp: E[x^2] - E[x]^2 can go slightly negative from cancellation.
    var = jnp.maximum(sq * inv_n - mean * mean, 0.0)
    rstd = jax.lax.rsqrt(var + LN_EPS)

    # Normalize only (gamma/beta are folded into w_ref / b_ref).
    even_n = ((even - mean) * rstd).astype(jnp.bfloat16).reshape(th * w2, c2)
    odd_n = ((odd - mean) * rstd).astype(jnp.bfloat16).reshape(th * w2, c2)

    # bf16 MXU matmuls with f32 accumulation (expressed as an accumulate so the
    # second dot can accumulate into the MXU result buffer on v7x).
    acc = jnp.dot(even_n, w_ref[0], preferred_element_type=jnp.float32)
    acc = acc + jnp.dot(odd_n, w_ref[1], preferred_element_type=jnp.float32)
    acc = acc + b_ref[...]                         # (1, 2C) broadcast bias
    o_ref[...] = acc.reshape(th, w2, c2).astype(o_ref.dtype)


def _round_up(a, m):
    return ((a + m - 1) // m) * m


def patch_merging_forward(x, input_resolution, w_reduction, ln_gamma, ln_beta,
                          *, max_tokens=None, out_dtype=None,
                          single_buffer_consts=True):
    """x: (B, H*W, C).  Returns (B, H//2 * W//2, 2*C)."""
    H, W = input_resolution
    B, L, C = x.shape
    assert L == H * W, "input feature has wrong size"
    assert H % 2 == 0 and W % 2 == 0, f"x size ({H}*{W}) are not even."
    H2, W2 = H // 2, W // 2
    C2 = 2 * C
    out_dtype = x.dtype if out_dtype is None else out_dtype

    # Metadata-free reshape into the row-pair view:
    #   xr[b*H2+i, p, j, q*C + c] == x[b, (2i+p)*W + 2j + q, c]
    xr = x.reshape(B * H2, 2, W2, C2)

    # --- permute + fold LayerNorm affine into the reduction weight ----------
    w_t = jnp.transpose(w_reduction).astype(jnp.float32)            # (4C, 2C)
    w_e = jnp.concatenate([w_t[0:C], w_t[2 * C:3 * C]], axis=0)     # rows for [x0|x2]
    w_o = jnp.concatenate([w_t[C:2 * C], w_t[3 * C:4 * C]], axis=0)  # rows for [x1|x3]

    g = ln_gamma.astype(jnp.float32)
    bt = ln_beta.astype(jnp.float32)
    g_e = jnp.concatenate([g[0:C], g[2 * C:3 * C]])
    g_o = jnp.concatenate([g[C:2 * C], g[3 * C:4 * C]])
    b_e = jnp.concatenate([bt[0:C], bt[2 * C:3 * C]])
    b_o = jnp.concatenate([bt[C:2 * C], bt[3 * C:4 * C]])

    # (x_hat * gamma + beta) @ W  ==  x_hat @ (diag(gamma) W)  +  beta @ W
    w_eo = jnp.stack([g_e[:, None] * w_e,
                      g_o[:, None] * w_o]).astype(jnp.bfloat16)      # (2, 2C, 2C)
    bias = (b_e @ w_e + b_o @ w_o).reshape(1, C2).astype(jnp.float32)  # (1, 2C)

    # --- generation-aware budgets -------------------------------------------
    in_itemsize = jnp.dtype(x.dtype).itemsize
    out_itemsize = jnp.dtype(out_dtype).itemsize
    try:
        vmem_capacity = int(pltpu.get_tpu_info().vmem_capacity_bytes)
    except Exception:
        vmem_capacity = None
    if vmem_capacity is None:
        vmem_capacity = 64 << 20          # unknown hardware: assume smallest VMEM
    small_vmem = vmem_capacity <= (64 << 20)    # v7x-class (64 MiB / TC)

    if max_tokens is None:
        max_tokens = 1024 if small_vmem else 4096
    stream_budget = (12 << 20) if small_vmem else (48 << 20)
    vmem_cap = (48 << 20) if small_vmem else (100 << 20)

    # Padded tile dims (sublane packing 8 for f32 / 16 for bf16, lane 128).
    sub_in = max(8, 32 // in_itemsize)
    sub_out = max(8, 32 // out_itemsize)
    C2p = _round_up(C2, 128)
    W2p_in = _round_up(W2, sub_in)
    W2p_out = _round_up(W2, sub_out)

    # --- tile selection: th row-pairs per grid step --------------------------
    R = B * H2                                   # total row-pairs
    stream_per_rowpair = 2 * (2 * W2p_in * C2p * in_itemsize       # x dbl-buffered
                              + W2p_out * C2p * out_itemsize)       # out dbl-buffered
    cap_rows = max(1, min(R,
                          stream_budget // max(1, stream_per_rowpair),
                          max(1, max_tokens // W2)))

    divisors = [d for d in range(1, R + 1) if R % d == 0 and d <= cap_rows]

    def _score(d):
        n = R // d
        # Prefer >=4 even steps (v7x dual-core balance + pipelining), then >=2
        # even, then >=2, then the largest tile.
        return ((n >= 4 and n % 2 == 0), (n >= 2 and n % 2 == 0), n >= 2, d)

    th = max(divisors, key=_score)
    nsteps = R // th

    # --- VMEM limit (padded estimate + headroom, generation-capped) ----------
    x_blk = th * 2 * W2p_in * C2p * in_itemsize
    o_blk = th * W2p_out * C2p * out_itemsize
    w_bytes = 2 * _round_up(C2, 16) * C2p * 2            # bf16 weight
    b_bytes = 8 * C2p * 4                                 # f32 bias (padded)
    const_bufs = 1 if single_buffer_consts else 2
    est = 2 * (x_blk + o_blk) + const_bufs * (w_bytes + b_bytes)
    vmem_limit = int(min(vmem_cap, max(est + (4 << 20), 32 << 20)))

    # --- BlockSpecs -----------------------------------------------------------
    x_spec = pl.BlockSpec((th, 2, W2, C2), lambda i: (i, 0, 0, 0))
    out_spec = pl.BlockSpec((th, W2, C2), lambda i: (i, 0, 0))
    if single_buffer_consts:
        w_spec = pl.BlockSpec((2, C2, C2), lambda i: (0, 0, 0),
                              pipeline_mode=pl.Buffered(1))
        b_spec = pl.BlockSpec((1, C2), lambda i: (0, 0),
                              pipeline_mode=pl.Buffered(1))
    else:
        w_spec = pl.BlockSpec((2, C2, C2), lambda i: (0, 0, 0))
        b_spec = pl.BlockSpec((1, C2), lambda i: (0, 0))

    out = pl.pallas_call(
        _patch_merging_kernel,
        out_shape=jax.ShapeDtypeStruct((R, W2, C2), out_dtype),
        grid_spec=pltpu.PrefetchScalarGridSpec(
            num_scalar_prefetch=0,
            grid=(nsteps,),
            in_specs=[x_spec, w_spec, b_spec],
            out_specs=out_spec,
        ),
        compiler_params=pltpu.CompilerParams(
            dimension_semantics=("parallel",),
            vmem_limit_bytes=vmem_limit,
        ),
    )(xr, w_eo, bias)

    # Metadata-free reshape back to the module's output layout.
    return out.reshape(B, H2 * W2, C2)


def _reference(x, input_resolution, w_reduction, ln_gamma, ln_beta):
    H, W = input_resolution
    B, L, C = x.shape
    xr = x.reshape(B, H, W, C)
    x0 = xr[:, 0::2, 0::2, :]
    x1 = xr[:, 1::2, 0::2, :]
    x2 = xr[:, 0::2, 1::2, :]
    x3 = xr[:, 1::2, 1::2, :]
    xm = jnp.concatenate([x0, x1, x2, x3], axis=-1).reshape(B, -1, 4 * C)
    mean = jnp.mean(xm, axis=-1, keepdims=True)
    var = jnp.mean((xm - mean) ** 2, axis=-1, keepdims=True)
    xn = (xm - mean) / jnp.sqrt(var + LN_EPS)
    xn = xn * ln_gamma + ln_beta
    return jnp.einsum("bld,od->blo", xn, w_reduction)


if __name__ == "__main__":
    key = jax.random.PRNGKey(0)
    B, H, W, dim = 2, 16, 16, 32                 # input_resolution=(16,16), dim=32

    k_x, k_w, k_g, k_b = jax.random.split(key, 4)
    x = jax.random.normal(k_x, (B, H * W, dim), dtype=jnp.float32)
    # nn.Linear(4*dim, 2*dim, bias=False): weight shape (2*dim, 4*dim)
    w_reduction = jax.random.normal(k_w, (2 * dim, 4 * dim), dtype=jnp.float32) * 0.05
    # nn.LayerNorm(4*dim) affine params (deterministic, non-trivial)
    ln_gamma = 1.0 + 0.1 * jax.random.normal(k_g, (4 * dim,), dtype=jnp.float32)
    ln_beta = 0.1 * jax.random.normal(k_b, (4 * dim,), dtype=jnp.float32)

    def run(single_buffer_consts):
        fwd = jax.jit(lambda xx, ww, gg, bb: patch_merging_forward(
            xx, (H, W), ww, gg, bb, single_buffer_consts=single_buffer_consts))
        return jax.block_until_ready(fwd(x, w_reduction, ln_gamma, ln_beta))

    try:
        out = run(True)
    except Exception:
        # Robustness: if this jax build rejects pipeline_mode=pl.Buffered(1),
        # rebuild with default (double-buffered) constant operands.
        out = run(False)

    ref = _reference(x, (H, W), w_reduction, ln_gamma, ln_beta)
    assert out.shape == (B, (H // 2) * (W // 2), 2 * dim), out.shape
    max_err = float(jnp.max(jnp.abs(out - ref)))
    # bf16 MXU operands (with gamma folded in) + f32 accumulation.
    assert jnp.allclose(out, ref, atol=2e-2, rtol=2e-2), max_err
    print("KERNEL_OK")
</pallas_src>

<mosaic_0001>
module attributes {stable_mosaic.version = 11 : i64} {
  func.func @_patch_merging_kernel(%arg0: i32, %arg1: memref<4x2x8x64xf32, #tpu.memory_space<vmem>>, %arg2: memref<2x64x64xbf16, #tpu.memory_space<vmem>>, %arg3: memref<1x64xf32, #tpu.memory_space<vmem>>, %arg4: memref<4x8x64xf32, #tpu.memory_space<vmem>>) attributes {dimension_semantics = [#tpu.dimension_semantics<parallel>], iteration_bounds = array<i64: 4>, scalar_prefetch = 0 : i64, scratch_operands = 0 : i64, tpu.core_type = #tpu.core_type<tc>, window_params = [{transform_indices = @transform_0, window_bounds = array<i64: 4, 2, 8, 64>}, {pipeline_mode = #tpu.pipeline_mode<synchronous>, transform_indices = @transform_1, window_bounds = array<i64: 2, 64, 64>}, {pipeline_mode = #tpu.pipeline_mode<synchronous>, transform_indices = @transform_2, window_bounds = array<i64: 1, 64>}, {transform_indices = @transform_3, window_bounds = array<i64: 4, 8, 64>}]} {
    %c0 = arith.constant 0 : index
    %c0_0 = arith.constant 0 : index
    %c0_1 = arith.constant 0 : index
    %c0_2 = arith.constant 0 : index
    %0 = vector.load %arg1[%c0, %c0_0, %c0_1, %c0_2] : memref<4x2x8x64xf32, #tpu.memory_space<vmem>>, vector<4x2x8x64xf32>
    %1 = vector.extract_strided_slice %0 {offsets = [0, 0, 0, 0], sizes = [4, 1, 8, 64], strides = [1, 1, 1, 1]} : vector<4x2x8x64xf32> to vector<4x1x8x64xf32>
    %2 = vector.shape_cast %1 : vector<4x1x8x64xf32> to vector<4x8x64xf32>
    %3 = vector.extract_strided_slice %0 {offsets = [0, 1, 0, 0], sizes = [4, 1, 8, 64], strides = [1, 1, 1, 1]} : vector<4x2x8x64xf32> to vector<4x1x8x64xf32>
    %4 = vector.shape_cast %3 : vector<4x1x8x64xf32> to vector<4x8x64xf32>
    %cst = arith.constant dense<0.000000e+00> : vector<4x8xf32>
    %5 = vector.multi_reduction <add>, %2, %cst [2] : vector<4x8x64xf32> to vector<4x8xf32>
    %6 = vector.shape_cast %5 : vector<4x8xf32> to vector<4x8x1xf32>
    %cst_3 = arith.constant dense<0.000000e+00> : vector<4x8xf32>
    %7 = vector.multi_reduction <add>, %4, %cst_3 [2] : vector<4x8x64xf32> to vector<4x8xf32>
    %8 = vector.shape_cast %7 : vector<4x8xf32> to vector<4x8x1xf32>
    %9 = arith.addf %6, %8 : vector<4x8x1xf32>
    %10 = arith.mulf %2, %2 : vector<4x8x64xf32>
    %cst_4 = arith.constant dense<0.000000e+00> : vector<4x8xf32>
    %11 = vector.multi_reduction <add>, %10, %cst_4 [2] : vector<4x8x64xf32> to vector<4x8xf32>
    %12 = vector.shape_cast %11 : vector<4x8xf32> to vector<4x8x1xf32>
    %13 = arith.mulf %4, %4 : vector<4x8x64xf32>
    %cst_5 = arith.constant dense<0.000000e+00> : vector<4x8xf32>
    %14 = vector.multi_reduction <add>, %13, %cst_5 [2] : vector<4x8x64xf32> to vector<4x8xf32>
    %15 = vector.shape_cast %14 : vector<4x8xf32> to vector<4x8x1xf32>
    %16 = arith.addf %12, %15 : vector<4x8x1xf32>
    %cst_6 = arith.constant 7.812500e-03 : f32
    %17 = vector.broadcast %cst_6 : f32 to vector<4x8x1xf32>
    %18 = arith.mulf %9, %17 : vector<4x8x1xf32>
    %cst_7 = arith.constant 7.812500e-03 : f32
    %19 = vector.broadcast %cst_7 : f32 to vector<4x8x1xf32>
    %20 = arith.mulf %16, %19 : vector<4x8x1xf32>
    %21 = arith.mulf %18, %18 : vector<4x8x1xf32>
    %22 = arith.subf %20, %21 : vector<4x8x1xf32>
    %cst_8 = arith.constant 0.000000e+00 : f32
    %23 = vector.broadcast %cst_8 : f32 to vector<4x8x1xf32>
    %24 = arith.maximumf %22, %23 : vector<4x8x1xf32>
    %cst_9 = arith.constant 9.99999974E-6 : f32
    %25 = vector.broadcast %cst_9 : f32 to vector<4x8x1xf32>
    %26 = arith.addf %24, %25 : vector<4x8x1xf32>
    %27 = math.rsqrt %26 : vector<4x8x1xf32>
    %28 = vector.broadcast %18 : vector<4x8x1xf32> to vector<4x8x64xf32>
    %29 = arith.subf %2, %28 : vector<4x8x64xf32>
    %30 = vector.broadcast %27 : vector<4x8x1xf32> to vector<4x8x64xf32>
    %31 = arith.mulf %29, %30 : vector<4x8x64xf32>
    %32 = arith.truncf %31 : vector<4x8x64xf32> to vector<4x8x64xbf16>
    %33 = vector.shape_cast %32 : vector<4x8x64xbf16> to vector<32x64xbf16>
    %34 = vector.broadcast %18 : vector<4x8x1xf32> to vector<4x8x64xf32>
    %35 = arith.subf %4, %34 : vector<4x8x64xf32>
    %36 = vector.broadcast %27 : vector<4x8x1xf32> to vector<4x8x64xf32>
    %37 = arith.mulf %35, %36 : vector<4x8x64xf32>
    %38 = arith.truncf %37 : vector<4x8x64xf32> to vector<4x8x64xbf16>
    %39 = vector.shape_cast %38 : vector<4x8x64xbf16> to vector<32x64xbf16>
    %c0_10 = arith.constant 0 : index
    %c0_11 = arith.constant 0 : index
    %c0_12 = arith.constant 0 : index
    %40 = vector.load %arg2[%c0_10, %c0_11, %c0_12] : memref<2x64x64xbf16, #tpu.memory_space<vmem>>, vector<1x64x64xbf16>
    %41 = vector.shape_cast %40 : vector<1x64x64xbf16> to vector<64x64xbf16>
    %cst_13 = arith.constant dense<0.000000e+00> : vector<32x64xf32>
    %42 = tpu.matmul %33, %41, %cst_13 {dimension_numbers = #tpu.dot_dimension_numbers<[1], [0], [0], [1], [0, 0, 1, 1], [], []>} : vector<32x64xbf16>, vector<64x64xbf16>, vector<32x64xf32> -> vector<32x64xf32>
    %c1 = arith.constant 1 : index
    %c0_14 = arith.constant 0 : index
    %c0_15 = arith.constant 0 : index
    %43 = vector.load %arg2[%c1, %c0_14, %c0_15] : memref<2x64x64xbf16, #tpu.memory_space<vmem>>, vector<1x64x64xbf16>
    %44 = vector.shape_cast %43 : vector<1x64x64xbf16> to vector<64x64xbf16>
    %cst_16 = arith.constant dense<0.000000e+00> : vector<32x64xf32>
    %45 = tpu.matmul %39, %44, %cst_16 {dimension_numbers = #tpu.dot_dimension_numbers<[1], [0], [0], [1], [0, 0, 1, 1], [], []>} : vector<32x64xbf16>, vector<64x64xbf16>, vector<32x64xf32> -> vector<32x64xf32>
    %46 = arith.addf %42, %45 : vector<32x64xf32>
    %c0_17 = arith.constant 0 : index
    %c0_18 = arith.constant 0 : index
    %47 = vector.load %arg3[%c0_17, %c0_18] : memref<1x64xf32, #tpu.memory_space<vmem>>, vector<1x64xf32>
    %48 = vector.broadcast %47 : vector<1x64xf32> to vector<32x64xf32>
    %49 = arith.addf %46, %48 : vector<32x64xf32>
    %50 = vector.shape_cast %49 : vector<32x64xf32> to vector<4x8x64xf32>
    %c0_19 = arith.constant 0 : index
    %c0_20 = arith.constant 0 : index
    %c0_21 = arith.constant 0 : index
    %51 = vector.load %arg4[%c0_19, %c0_20, %c0_21] : memref<4x8x64xf32, #tpu.memory_space<vmem>>, vector<4x8x64xf32>
    tpu.vector_store %arg4[%c0_19, %c0_20, %c0_21], %50 {strides = array<i32>} : memref<4x8x64xf32, #tpu.memory_space<vmem>>, vector<4x8x64xf32>,
    return
  }
  func.func @transform_0(%arg0: i32) -> (i32, i32, i32, i32) {
    %c0_i32 = arith.constant 0 : i32
    %c0_i32_0 = arith.constant 0 : i32
    %c0_i32_1 = arith.constant 0 : i32
    %c0_i32_2 = arith.constant 0 : i32
    return %arg0, %c0_i32, %c0_i32_0, %c0_i32_1 : i32, i32, i32, i32
  }
  func.func @transform_1(%arg0: i32) -> (i32, i32, i32) {
    %c0_i32 = arith.constant 0 : i32
    %c0_i32_0 = arith.constant 0 : i32
    %c0_i32_1 = arith.constant 0 : i32
    %c0_i32_2 = arith.constant 0 : i32
    return %c0_i32, %c0_i32_0, %c0_i32_1 : i32, i32, i32
  }
  func.func @transform_2(%arg0: i32) -> (i32, i32) {
    %c0_i32 = arith.constant 0 : i32
    %c0_i32_0 = arith.constant 0 : i32
    %c0_i32_1 = arith.constant 0 : i32
    return %c0_i32, %c0_i32_0 : i32, i32
  }
  func.func @transform_3(%arg0: i32) -> (i32, i32, i32) {
    %c0_i32 = arith.constant 0 : i32
    %c0_i32_0 = arith.constant 0 : i32
    %c0_i32_1 = arith.constant 0 : i32
    return %arg0, %c0_i32, %c0_i32_0 : i32, i32, i32
  }
}

module attributes {stable_mosaic.version = 11 : i64} {
  func.func @_patch_merging_kernel(%arg0: i32, %arg1: memref<4x2x8x64xf32, #tpu.memory_space<vmem>>, %arg2: memref<2x64x64xbf16, #tpu.memory_space<vmem>>, %arg3: memref<1x64xf32, #tpu.memory_space<vmem>>, %arg4: memref<4x8x64xf32, #tpu.memory_space<vmem>>) attributes {dimension_semantics = [#tpu.dimension_semantics<parallel>], iteration_bounds = array<i64: 4>, scalar_prefetch = 0 : i64, scratch_operands = 0 : i64, tpu.core_type = #tpu.core_type<tc>, window_params = [{transform_indices = @transform_0, window_bounds = array<i64: 4, 2, 8, 64>}, {pipeline_mode = #tpu.pipeline_mode<synchronous>, transform_indices = @transform_1, window_bounds = array<i64: 2, 64, 64>}, {pipeline_mode = #tpu.pipeline_mode<synchronous>, transform_indices = @transform_2, window_bounds = array<i64: 1, 64>}, {transform_indices = @transform_3, window_bounds = array<i64: 4, 8, 64>}]} {
    %c0 = arith.constant 0 : index
    %c0_0 = arith.constant 0 : index
    %c0_1 = arith.constant 0 : index
    %c0_2 = arith.constant 0 : index
    %0 = vector.load %arg1[%c0, %c0_0, %c0_1, %c0_2] : memref<4x2x8x64xf32, #tpu.memory_space<vmem>>, vector<4x2x8x64xf32>
    %1 = vector.extract_strided_slice %0 {offsets = [0, 0, 0, 0], sizes = [4, 1, 8, 64], strides = [1, 1, 1, 1]} : vector<4x2x8x64xf32> to vector<4x1x8x64xf32>
    %2 = vector.shape_cast %1 : vector<4x1x8x64xf32> to vector<4x8x64xf32>
    %3 = vector.extract_strided_slice %0 {offsets = [0, 1, 0, 0], sizes = [4, 1, 8, 64], strides = [1, 1, 1, 1]} : vector<4x2x8x64xf32> to vector<4x1x8x64xf32>
    %4 = vector.shape_cast %3 : vector<4x1x8x64xf32> to vector<4x8x64xf32>
    %cst = arith.constant dense<0.000000e+00> : vector<4x8xf32>
    %5 = vector.multi_reduction <add>, %2, %cst [2] : vector<4x8x64xf32> to vector<4x8xf32>
    %6 = vector.shape_cast %5 : vector<4x8xf32> to vector<4x8x1xf32>
    %cst_3 = arith.constant dense<0.000000e+00> : vector<4x8xf32>
    %7 = vector.multi_reduction <add>, %4, %cst_3 [2] : vector<4x8x64xf32> to vector<4x8xf32>
    %8 = vector.shape_cast %7 : vector<4x8xf32> to vector<4x8x1xf32>
    %9 = arith.addf %6, %8 : vector<4x8x1xf32>
    %10 = arith.mulf %2, %2 : vector<4x8x64xf32>
    %cst_4 = arith.constant dense<0.000000e+00> : vector<4x8xf32>
    %11 = vector.multi_reduction <add>, %10, %cst_4 [2] : vector<4x8x64xf32> to vector<4x8xf32>
    %12 = vector.shape_cast %11 : vector<4x8xf32> to vector<4x8x1xf32>
    %13 = arith.mulf %4, %4 : vector<4x8x64xf32>
    %cst_5 = arith.constant dense<0.000000e+00> : vector<4x8xf32>
    %14 = vector.multi_reduction <add>, %13, %cst_5 [2] : vector<4x8x64xf32> to vector<4x8xf32>
    %15 = vector.shape_cast %14 : vector<4x8xf32> to vector<4x8x1xf32>
    %16 = arith.addf %12, %15 : vector<4x8x1xf32>
    %cst_6 = arith.constant 7.812500e-03 : f32
    %17 = vector.broadcast %cst_6 : f32 to vector<4x8x1xf32>
    %18 = arith.mulf %9, %17 : vector<4x8x1xf32>
    %cst_7 = arith.constant 7.812500e-03 : f32
    %19 = vector.broadcast %cst_7 : f32 to vector<4x8x1xf32>
    %20 = arith.mulf %16, %19 : vector<4x8x1xf32>
    %21 = arith.mulf %18, %18 : vector<4x8x1xf32>
    %22 = arith.subf %20, %21 : vector<4x8x1xf32>
    %cst_8 = arith.constant 0.000000e+00 : f32
    %23 = vector.broadcast %cst_8 : f32 to vector<4x8x1xf32>
    %24 = arith.maximumf %22, %23 : vector<4x8x1xf32>
    %cst_9 = arith.constant 9.99999974E-6 : f32
    %25 = vector.broadcast %cst_9 : f32 to vector<4x8x1xf32>
    %26 = arith.addf %24, %25 : vector<4x8x1xf32>
    %27 = math.rsqrt %26 : vector<4x8x1xf32>
    %28 = vector.broadcast %18 : vector<4x8x1xf32> to vector<4x8x64xf32>
    %29 = arith.subf %2, %28 : vector<4x8x64xf32>
    %30 = vector.broadcast %27 : vector<4x8x1xf32> to vector<4x8x64xf32>
    %31 = arith.mulf %29, %30 : vector<4x8x64xf32>
    %32 = arith.truncf %31 : vector<4x8x64xf32> to vector<4x8x64xbf16>
    %33 = vector.shape_cast %32 : vector<4x8x64xbf16> to vector<32x64xbf16>
    %34 = vector.broadcast %18 : vector<4x8x1xf32> to vector<4x8x64xf32>
    %35 = arith.subf %4, %34 : vector<4x8x64xf32>
    %36 = vector.broadcast %27 : vector<4x8x1xf32> to vector<4x8x64xf32>
    %37 = arith.mulf %35, %36 : vector<4x8x64xf32>
    %38 = arith.truncf %37 : vector<4x8x64xf32> to vector<4x8x64xbf16>
    %39 = vector.shape_cast %38 : vector<4x8x64xbf16> to vector<32x64xbf16>
    %c0_10 = arith.constant 0 : index
    %c0_11 = arith.constant 0 : index
    %c0_12 = arith.constant 0 : index
    %40 = vector.load %arg2[%c0_10, %c0_11, %c0_12] : memref<2x64x64xbf16, #tpu.memory_space<vmem>>, vector<1x64x64xbf16>
    %41 = vector.shape_cast %40 : vector<1x64x64xbf16> to vector<64x64xbf16>
    %cst_13 = arith.constant dense<0.000000e+00> : vector<32x64xf32>
    %42 = tpu.matmul %33, %41, %cst_13 {dimension_numbers = #tpu.dot_dimension_numbers<[1], [0], [0], [1], [0, 0, 1, 1], [], []>} : vector<32x64xbf16>, vector<64x64xbf16>, vector<32x64xf32> -> vector<32x64xf32>
    %c1 = arith.constant 1 : index
    %c0_14 = arith.constant 0 : index
    %c0_15 = arith.constant 0 : index
    %43 = vector.load %arg2[%c1, %c0_14, %c0_15] : memref<2x64x64xbf16, #tpu.memory_space<vmem>>, vector<1x64x64xbf16>
    %44 = vector.shape_cast %43 : vector<1x64x64xbf16> to vector<64x64xbf16>
    %cst_16 = arith.constant dense<0.000000e+00> : vector<32x64xf32>
    %45 = tpu.matmul %39, %44, %cst_16 {dimension_numbers = #tpu.dot_dimension_numbers<[1], [0], [0], [1], [0, 0, 1, 1], [], []>} : vector<32x64xbf16>, vector<64x64xbf16>, vector<32x64xf32> -> vector<32x64xf32>
    %46 = arith.addf %42, %45 : vector<32x64xf32>
    %c0_17 = arith.constant 0 : index
    %c0_18 = arith.constant 0 : index
    %47 = vector.load %arg3[%c0_17, %c0_18] : memref<1x64xf32, #tpu.memory_space<vmem>>, vector<1x64xf32>
    %48 = vector.broadcast %47 : vector<1x64xf32> to vector<32x64xf32>
    %49 = arith.addf %46, %48 : vector<32x64xf32>
    %50 = vector.shape_cast %49 : vector<32x64xf32> to vector<4x8x64xf32>
    %c0_19 = arith.constant 0 : index
    %c0_20 = arith.constant 0 : index
    %c0_21 = arith.constant 0 : index
    %51 = vector.load %arg4[%c0_19, %c0_20, %c0_21] : memref<4x8x64xf32, #tpu.memory_space<vmem>>, vector<4x8x64xf32>
    tpu.vector_store %arg4[%c0_19, %c0_20, %c0_21], %50 {strides = array<i32>} : memref<4x8x64xf32, #tpu.memory_space<vmem>>, vector<4x8x64xf32>,
    return
  }
  func.func @transform_0(%arg0: i32) -> (i32, i32, i32, i32) {
    %c0_i32 = arith.constant 0 : i32
    %c0_i32_0 = arith.constant 0 : i32
    %c0_i32_1 = arith.constant 0 : i32
    %c0_i32_2 = arith.constant 0 : i32
    return %arg0, %c0_i32, %c0_i32_0, %c0_i32_1 : i32, i32, i32, i32
  }
  func.func @transform_1(%arg0: i32) -> (i32, i32, i32) {
    %c0_i32 = arith.constant 0 : i32
    %c0_i32_0 = arith.constant 0 : i32
    %c0_i32_1 = arith.constant 0 : i32
    %c0_i32_2 = arith.constant 0 : i32
    return %c0_i32, %c0_i32_0, %c0_i32_1 : i32, i32, i32
  }
  func.func @transform_2(%arg0: i32) -> (i32, i32) {
    %c0_i32 = arith.constant 0 : i32
    %c0_i32_0 = arith.constant 0 : i32
    %c0_i32_1 = arith.constant 0 : i32
    return %c0_i32, %c0_i32_0 : i32, i32
  }
  func.func @transform_3(%arg0: i32) -> (i32, i32, i32) {
    %c0_i32 = arith.constant 0 : i32
    %c0_i32_0 = arith.constant 0 : i32
    %c0_i32_1 = arith.constant 0 : i32
    return %arg0, %c0_i32, %c0_i32_0 : i32, i32, i32
  }
}

</mosaic_0001>

<bundles_post_ra>
// kernel: _lambda_.1
= control target key start
LH: loop header
LB: loop body
LE: loop exit
PB: predicated region body
PF: predicated region fallthrough
CT: control target
= control target key end

     0   :  { %8 = vsyncpa [#allocation3], 0  ;;  %s1016_s0 = inlined_call_operand.vmem [shape: f32[16,2,8,64], index: 0, kind: input, shape index: {}]   ;;  %s1017_s1 = inlined_call_operand.vmem [shape: bf16[2,64,64], index: 1, kind: input, shape index: {}]   ;;  %s1018_s2 = inlined_call_operand.vmem [shape: f32[1,64], index: 2, kind: input, shape index: {}]   ;;  %s1019_s3 = inlined_call_operand.hbm [shape: f32[16,8,64], index: 3, kind: output, shape index: {}]  }
   0x1   :  { %10 = vsyncpa [#allocation3 + $0x1], 0  ;;  %s815_s12 = smov 0   ;;  %s817_s13 = smov 0  }
   0x2   :  { %s819_s14 = smov 0   ;;  %s821_s15 = smov 0  }
   0x3 LB: > { %s836_s16 = sadd.s32 4294967295, %s790_s15   ;;  %s587_s17 = sadd.s32 4294967294, %s790_s15   ;;  %s790_s15 = sphi %s821_s15, %s1025_s15   ;;  %s786_s14 = sphi %s819_s14, %s1024_s14   ;;  %s782_s13 = sphi %s817_s13, %s1023_s13   ;;  %s778_s12 = sphi %s815_s12, %s1022_s12  }
   0x4   : > { %s840_s18 = sadd.s32 1, %s790_s15   ;;  %s91_s19 = sadd.s32 1, %s786_s14 }
   0x5   : > { %s88_s20 = ssub.s32 %s790_s15, %s840_s18  ;;  %p101_p0 = scmp.ne.s32.totalorder %s786_s14, %s782_s13 }
   0x6   : > { %p89_p1 = scmp.eq.s32.totalorder %s88_s20, 0  ;;  %p102_p2 = scmp.eq.s32.totalorder %s836_s16, 3 }
   0x7   : > { %p107_p3 = scmp.ne.s32.totalorder %s782_s13, %s778_s12  ;;  %p108_p4 = scmp.eq.s32.totalorder %s587_s17, 3 }
   0x8   : > { %s851_s21 = scalar_select %p89_p1, %s786_s14, %s91_s19  }
   0x9   : > { %p853_p5 = por %p102_p2, %p101_p0  ;;  %p857_p6 = por %p108_p4, %p107_p3 }
   0xa   : > { %p590_p7 = scmp.ge.s32.totalorder %s790_s15, 1  ;;  %p142_p8 = scmp.lt.s32.totalorder %s790_s15, 5 }
   0xc   : > { %p143_p9 = pnand %p590_p7, %p142_p8 }
   0xd   : > { %s592_s24 = sshll.u32 (!%p143_p9), %s836_s16, 2  ;;  %vm184_vm0 = vcmask (!%p143_p9), 523264   ;;  %v712_v32 = vld [vmem:[%s1017_s1 + $0x20] sm:$0xff] (!%p143_p9)   ;;  %v714_v34 = vld [vmem:[%s1017_s1 + $0x28] sm:$0xff] (!%p143_p9)   ;;  %v716_v36 = vld [vmem:[%s1017_s1 + $0x30] sm:$0xff] (!%p143_p9)   ;;  %s164_s27 = sand.u32 (!%p143_p9), 1, %s782_s13  }
   0xe   : > { %146 = sbr.rel (%p143_p9) target bundleno = 456 (0x1c8), region = 32  ;;  %p168_p10 = scmp.lt.s32.totalorder (!%p143_p9), %s592_s24, 15  ;;  %v713_v33 = vld [vmem:[%s1017_s1] sm:$0xff] (!%p143_p9)   ;;  %643 = vmatprep.subr.bf16.mxu1 (!%p143_p9), %v712_v32  ;;  %v715_v35 = vld [vmem:[%s1017_s1 + $0x8] sm:$0xff] (!%p143_p9)   ;;  %v717_v37 = vld [vmem:[%s1017_s1 + $0x10] sm:$0xff] (!%p143_p9)  }
   0xf   : > { %655 = vmatprep.subr.bf16.mxu0 (!%p143_p9), %v713_v33  ;;  %644 = vmatpush3.bf16.msra.mxu1 (!%p143_p9), %v712_v32  ;;  %v718_v38 = vld [vmem:[%s1017_s1 + $0x38] sm:$0xff] (!%p143_p9)   ;;  %s630_s6 = sshll.u32 (!%p143_p9), %s836_s16, 9  ;;  %s975_s16 = scalar_lea.sflag (!%p143_p9), [#allocation3], %s164_s27 }
  0x10   : > { %656 = vmatpush3.bf16.msra.mxu0 (!%p143_p9), %v713_v33  ;;  %645 = vmatprep.subr.bf16.mxu1 (!%p143_p9), %v714_v34  ;;  %v719_v39 = vld [vmem:[%s1017_s1 + $0x18] sm:$0xff] (!%p143_p9)   ;;  %s968_s9 = scalar_lea.hbm (!%p143_p9), %s1019_s3, %s630_s6  ;;  %s792_s11 = smov (!%p143_p9), [#allocation2]  }
  0x11   : > { %657 = vmatprep.subr.bf16.mxu0 (!%p143_p9), %v715_v35  ;;  %s732_s17 = sshll.u32 (!%p143_p9), %s792_s11, 4  ;;  %s733_s17 = int_to_ptr.vmem [resolvable:$false] %s732_s17 }
  0x12   : > { %s734_s19 = scalar_lea.vmem (!%p143_p9), %s733_s17, 1024 }
  0x13   : > { %646 = vmatpush3.bf16.msra.mxu1 (!%p143_p9), %v714_v34 }
  0x14   : > { %658 = vmatpush3.bf16.msra.mxu0 (!%p143_p9), %v715_v35  ;;  %647 = vmatprep.subr.bf16.mxu1 (!%p143_p9), %v716_v36 }
  0x15   : > { %s1027_s24 = smov (!%p168_p10, %s592_s24), 15  ;;  %659 = vmatprep.subr.bf16.mxu0 %v717_v37 }
  0x16   : > { %s625_s25 = sshll.u32 %s1027_s24, 4 }
  0x17   : > { %s172_s28 = scalar_lea.vmem %s1016_s0, %s625_s25  ;;  %648 = vmatpush3.bf16.msra.mxu1 %v716_v36 }
  0x18   : > { %v867_v0 = vld [vmem:[%s172_s28 + $0x8] sm:$0xff]  ;;  %v869_v1 = vld [vmem:[%s172_s28] sm:$0xff]  ;;  %v871_v2 = vld [vmem:[%s172_s28 + $0x18] sm:$0xff]  ;;  %660 = vmatpush3.bf16.msra.mxu0 %v717_v37  ;;  %649 = vmatprep.subr.bf16.mxu1 %v718_v38 }
  0x19   : > { %v197_v3 = vsel %vm184_vm0, %v867_v0, 0.0  ;;  %v185_v4 = vsel %vm184_vm0, %v869_v1, 0.0  ;;  %v877_v5 = vld [vmem:[%s172_s28 + $0x10] sm:$0xff]  ;;  %v200_v6 = vsel %vm184_vm0, %v871_v2, 0.0  ;;  %v885_v9 = vld [vmem:[%s172_s28 + $0x20] sm:$0xff]  ;;  %v891_v12 = vld [vmem:[%s172_s28 + $0x38] sm:$0xff]  ;;  %v213_v17 = vmul.f32 %v869_v1, %v869_v1  ;;  %661 = vmatprep.subr.bf16.mxu0 %v719_v39 }
  0x1a   : > { %198 = vadd.xlane.f32.xlu1 %v197_v3  ;;  %186 = vadd.xlane.f32.xlu0 %v185_v4  ;;  %v188_v7 = vsel %vm184_vm0, %v877_v5, 0.0  ;;  %v883_v8 = vld [vmem:[%s172_s28 + $0x30] sm:$0xff]  ;;  %v191_v11 = vsel %vm184_vm0, %v885_v9, 0.0  ;;  %v893_v13 = vld [vmem:[%s172_s28 + $0x28] sm:$0xff]  ;;  %v206_v14 = vsel %vm184_vm0, %v891_v12, 0.0  ;;  %v214_v16 = vmul.f32 %v877_v5, %v877_v5  ;;  %s591_s28 = sshll.u32 %s164_s27, 5 }
  0x1b   : > { %v194_v10 = vsel %vm184_vm0, %v883_v8, 0.0  ;;  %v203_v15 = vsel %vm184_vm0, %v893_v13, 0.0  ;;  %v217_v19 = vsel %vm184_vm0, %v213_v17, 0.0  ;;  %v230_v20 = vmul.f32 %v871_v2, %v871_v2  ;;  %650 = vmatpush3.bf16.msra.mxu1 %v718_v38  ;;  %s166_s4 = scalar_lea.vmem [#allocation2], %s591_s28 }
  0x1c   : > { %v220_v18 = vsel %vm184_vm0, %v214_v16, 0.0  ;;  %v229_v21 = vmul.f32 %v867_v0, %v867_v0  ;;  %v216_v24 = vmul.f32 %v883_v8, %v883_v8  ;;  %v215_v25 = vmul.f32 %v885_v9, %v885_v9  ;;  %662 = vmatpush3.bf16.msra.mxu0 %v719_v39  ;;  %s525_s5 = sshll.u32 %s166_s4, 4  ;;  %s970_s5 = int_to_ptr.vmem [resolvable:$true] %s525_s5 }
  0x1d   : > { %v236_v22 = vsel %vm184_vm0, %v230_v20, 0.0  ;;  %v232_v28 = vmul.f32 %v891_v12, %v891_v12  ;;  %v231_v29 = vmul.f32 %v893_v13, %v893_v13  ;;  %s728_s10 = scalar_lea.vmem %s970_s5, 512  ;;  %p735_p0 = scmp.lt.s32.totalorder %s970_s5, %s733_s17 }
  0x1e   : > { %201 = vadd.xlane.f32.xlu1 %v200_v6  ;;  %189 = vadd.xlane.f32.xlu0 %v188_v7  ;;  %v233_v23 = vsel %vm184_vm0, %v229_v21, 0.0  ;;  %v226_v26 = vsel %vm184_vm0, %v216_v24, 0.0  ;;  %v223_v27 = vsel %vm184_vm0, %v215_v25, 0.0  ;;  %p729_p11 = scmp.ne.s32.totalorder %s970_s5, %s728_s10  ;;  %p736_p1 = scmp.lt.s32.totalorder %s734_s19, %s728_s10 }
  0x1f   : > { %v242_v30 = vsel %vm184_vm0, %v232_v28, 0.0  ;;  %v239_v31 = vsel %vm184_vm0, %v231_v29, 0.0 }
  0x20   : > { %p730_p12 = pnand %p729_p11, %p853_p5  ;;  %p737_p2 = por %p736_p1, %p735_p0 }
  0x22   : > { %195 = vadd.xlane.f32.xlu1 %v194_v10  ;;  %192 = vadd.xlane.f32.xlu0 %v191_v11  ;;  %p731_p13 = pneg %p730_p12 }
  0x24   : > { %p738_p3 = pnand %p737_p2, %p731_p13 }
  0x26   : > { %207 = vadd.xlane.f32.xlu1 %v206_v14  ;;  %204 = vadd.xlane.f32.xlu0 %v203_v15 }
  0x2a   : > { %221 = vadd.xlane.f32.xlu1 %v220_v18  ;;  %218 = vadd.xlane.f32.xlu0 %v217_v19 }
  0x2e   : > { %237 = vadd.xlane.f32.xlu1 %v236_v22  ;;  %234 = vadd.xlane.f32.xlu0 %v233_v23 }
  0x32   : > { %227 = vadd.xlane.f32.xlu1 %v226_v26  ;;  %224 = vadd.xlane.f32.xlu0 %v223_v27 }
  0x36   : > { %243 = vadd.xlane.f32.xlu1 %v242_v30  ;;  %240 = vadd.xlane.f32.xlu0 %v239_v31 }
  0xa7   : > { %v199_v40 = vpop.xlane.xlu1 %198  ;;  %v187_v41 = vpop.xlane.xlu0 %186 }
  0xa8   : > { %v209_v48 = vadd.f32 %v199_v40, %v187_v41 }
  0xaa   : > { %v249_v52 = vmul.f32 0.0078125, %v209_v48 }
  0xab   : > { %v202_v42 = vpop.xlane.xlu1 %201  ;;  %v190_v43 = vpop.xlane.xlu0 %189 }
  0xac   : > { %v210_v49 = vadd.f32 %v202_v42, %v190_v43  ;;  %v257_v59 = vmul.f32 %v249_v52, %v249_v52  ;;  %v289_v35 = vsub.f32 %v867_v0, %v249_v52  ;;  %v277_v36 = vsub.f32 %v869_v1, %v249_v52 }
  0xae   : > { %v250_v53 = vmul.f32 0.0078125, %v210_v49 }
  0xaf   : > { %v196_v44 = vpop.xlane.xlu1 %195  ;;  %v193_v45 = vpop.xlane.xlu0 %192 }
  0xb0   : > { %v258_v62 = vmul.f32 %v250_v53, %v250_v53  ;;  %v290_v32 = vsub.f32 %v871_v2, %v250_v53  ;;  %v278_v33 = vsub.f32 %v877_v5, %v250_v53 }
  0xb3   : > { %v208_v46 = vpop.xlane.xlu1 %207  ;;  %v205_v47 = vpop.xlane.xlu0 %204 }
  0xb4   : > { %v212_v58 = vadd.f32 %v208_v46, %v196_v44  ;;  %v211_v60 = vadd.f32 %v205_v47, %v193_v45 }
  0xb6   : > { %v252_v10 = vmul.f32 0.0078125, %v212_v58  ;;  %v251_v11 = vmul.f32 0.0078125, %v211_v60 }
  0xb7   : > { %v222_v50 = vpop.xlane.xlu1 %221  ;;  %v219_v51 = vpop.xlane.xlu0 %218 }
  0xb8   : > { %v260_v22 = vmul.f32 %v252_v10, %v252_v10  ;;  %v259_v24 = vmul.f32 %v251_v11, %v251_v11  ;;  %v280_v2 = vsub.f32 %v883_v8, %v252_v10  ;;  %v292_v5 = vsub.f32 %v891_v12, %v252_v10 }
  0xb9   : > { %v279_v0 = vsub.f32 %v885_v9, %v251_v11  ;;  %v291_v1 = vsub.f32 %v893_v13, %v251_v11  ;;  %v619_v9 = vld [vmem:[%s1018_s2] ss:$0 sm:$0xff] }
  0xbb   : > { %v238_v54 = vpop.xlane.xlu1 %237  ;;  %v235_v55 = vpop.xlane.xlu0 %234 }
  0xbc   : > { %v246_v56 = vadd.f32 %v238_v54, %v222_v50  ;;  %v245_v57 = vadd.f32 %v235_v55, %v219_v51 }
  0xbe   : > { %v254_v61 = vmul.f32 0.0078125, %v246_v56  ;;  %v253_v63 = vmul.f32 0.0078125, %v245_v57 }
  0xbf   : > { %v228_v3 = vpop.xlane.xlu1 %227  ;;  %v225_v4 = vpop.xlane.xlu0 %224 }
  0xc0   : > { %v262_v6 = vsub.f32 %v254_v61, %v258_v62  ;;  %v261_v7 = vsub.f32 %v253_v63, %v257_v59 }
  0xc2   : > { %v266_v14 = vmax.f32 %v262_v6, 0.0  ;;  %v265_v15 = vmax.f32 %v261_v7, 0.0 }
  0xc3   : > { %v244_v16 = vpop.xlane.xlu1 %243  ;;  %v241_v17 = vpop.xlane.xlu0 %240 }
  0xc4   : > { %v270_v18 = vadd.f32 1e-05, %v266_v14  ;;  %v269_v19 = vadd.f32 1e-05, %v265_v15  ;;  %v248_v20 = vadd.f32 %v244_v16, %v228_v3  ;;  %v247_v21 = vadd.f32 %v241_v17, %v225_v4 }
  0xc6   : > { %720 = vrsqrt.f32 %v270_v18  ;;  %v256_v23 = vmul.f32 0.0078125, %v248_v20  ;;  %v255_v25 = vmul.f32 0.0078125, %v247_v21 }
  0xc7   : > { %722 = vrsqrt.f32 %v269_v19 }
  0xc8   : > { %v264_v26 = vsub.f32 %v256_v23, %v260_v22  ;;  %v263_v27 = vsub.f32 %v255_v25, %v259_v24 }
  0xca   : > { %v268_v28 = vmax.f32 %v264_v26, 0.0  ;;  %v267_v29 = vmax.f32 %v263_v27, 0.0 }
  0xcc   : > { %v272_v30 = vadd.f32 1e-05, %v268_v28  ;;  %v271_v31 = vadd.f32 1e-05, %v267_v29 }
  0xce   : > { %724 = vrsqrt.f32 %v272_v30 }
  0xcf   : > { %726 = vrsqrt.f32 %v271_v31 }
  0xd0   : > { %v721_v34 = vpop.eup %720 }
  0xd1   : > { %v723_v37 = vpop.eup %722  ;;  %v294_v38 = vmul.f32 %v721_v34, %v290_v32  ;;  %v282_v39 = vmul.f32 %v721_v34, %v278_v33 }
  0xd2   : > { %v293_v40 = vmul.f32 %v723_v37, %v289_v35  ;;  %v281_v41 = vmul.f32 %v723_v37, %v277_v36 }
  0xd4   : > { %v626_v42 = vpack.c.bf16 %v294_v38, %v293_v40  ;;  %v628_v43 = vpack.c.bf16 %v282_v39, %v281_v41 }
  0xd6   : > { %651 = vmatprep.mubr.msk.bf16.mxu1 %vm184_vm0, %v626_v42  ;;  %663 = vmatprep.mubr.msk.bf16.mxu0 %vm184_vm0, %v628_v43 }
  0xd8   : > { %v725_v44 = vpop.eup %724 }
  0xd9   : > { %v727_v45 = vpop.eup %726  ;;  %v296_v46 = vmul.f32 %v725_v44, %v292_v5  ;;  %v284_v47 = vmul.f32 %v725_v44, %v280_v2 }
  0xda   : > { %v295_v48 = vmul.f32 %v727_v45, %v291_v1  ;;  %v283_v49 = vmul.f32 %v727_v45, %v279_v0 }
  0xdc   : > { %v627_v50 = vpack.c.bf16 %v296_v46, %v295_v48  ;;  %v629_v51 = vpack.c.bf16 %v284_v47, %v283_v49 }
  0xde   : > { %652 = vmatmul.mubr.msk.bf16.vlgmr.msra.gmra.mrb[0].mxu1 %vm184_vm0, %v627_v50  ;;  %664 = vmatmul.mubr.msk.bf16.vlgmr.msra.gmra.mrb[0].mxu0 %vm184_vm0, %v629_v51 }
 0x1b1   : > { %v653_v8 = vpop.f32.mrb[0].mxu1  ;;  %v665_v12 = vpop.f32.mrb[0].mxu0 }
 0x1b2   : > { %v490_v13 = vadd.f32 %v665_v12, %v653_v8  ;;  %v392_v52 = vpop.f32.mrb[1].mxu1  ;;  %v481_v53 = vpop.f32.mrb[1].mxu0 }
 0x1b3   : > { %v482_v54 = vadd.f32 %v481_v53, %v392_v52  ;;  %v654_v55 = vpop.f32.mrb[2].mxu1  ;;  %v666_v56 = vpop.f32.mrb[2].mxu0 }
 0x1b4   : > { %v505_v57 = vadd.f32 %v619_v9, %v490_v13  ;;  %v493_v58 = vadd.f32 %v666_v56, %v654_v55  ;;  %v395_v59 = vpop.f32.mrb[3].mxu1  ;;  %v484_v60 = vpop.f32.mrb[3].mxu0 }
 0x1b5   : > { %v503_v61 = vadd.f32 %v619_v9, %v482_v54  ;;  %v485_v62 = vadd.f32 %v484_v60, %v395_v59 }
 0x1b6   : > { %509 = vst.msk [vmem:[%s166_s4 + $0x10] sm:$0xff] %vm184_vm0, %v505_v57  ;;  %v506_v63 = vadd.f32 %v619_v9, %v493_v58 }
 0x1b7   : > { %507 = vst.msk [vmem:[%s166_s4] sm:$0xff] %vm184_vm0, %v503_v61  ;;  %v504_v3 = vadd.f32 %v619_v9, %v485_v62 }
 0x1b8   : > { %510 = vst.msk [vmem:[%s166_s4 + $0x18] sm:$0xff] %vm184_vm0, %v506_v63 }
 0x1b9   : > { %508 = vst.msk [vmem:[%s166_s4 + $0x8] sm:$0xff] %vm184_vm0, %v504_v3 }
 0x1ba   : > { %741 = shalt.err (!%p738_p3)
}
 0x1bb   : > { %s742_s20 = scalar_lea.hbm %s968_s9, 512  ;;  %s746_s26 = scalar_lea.hbm %s1019_s3, 2048 }
 0x1bc   : > { %p743_p4 = scmp.ne.s32.totalorder %s968_s9, %s742_s20  ;;  %p747_p9 = scmp.lt.u32.totalorder %s968_s9, %s1019_s3 }
 0x1bd   : > { %p748_p10 = scmp.lt.u32.totalorder %s746_s26, %s742_s20  ;;  %p750_p12 = scmp.lt.u32.totalorder %s742_s20, %s968_s9 }
 0x1be   : > { %p744_p7 = pnand %p743_p4, %p853_p5 }
 0x1bf   : > { %p749_p11 = por %p748_p10, %p747_p9 }
 0x1c0   : > { %p745_p8 = pneg %p744_p7 }
 0x1c1   : > { %p751_p13 = por %p750_p12, %p749_p11 }
 0x1c3   : > { %p752_p0 = pnand %p751_p13, %p745_p8 }
 0x1c5   : > { %755 = shalt.err (!%p752_p0)
}
 0x1c6   : > { %s793_s29 = smov 128   ;;  %s794_s30 = smov 8  }
 0x1c7   : > { %671 = dma.vmem_to_hbm [thread:$0]  (%p853_p5), %s970_s5, 512, %s968_s9, %s975_s16, %s793_s29, %s793_s29, %s794_s30  }
 0x1c8 PF: > { %p677_p1 = scmp.ge.s32.totalorder %s790_s15, 2  ;;  %s540_s4 = sand.u32 1, %s778_s12  }
 0x1c9   : > { %s541_s6 = scalar_lea.sflag [#allocation3], %s540_s4 }
 0x1ca   : > { %p674_p2 = pnand %p677_p1, %p857_p6 }
 0x1cc   : > { %773 = dma.done.wait (!%p674_p2), %s541_s6, 512  }
 0x1cd   : > { %775 = vsyncadd (!%p674_p2), %s541_s6, 4294966784  ;;  %p13_p3 = scmp.ge.s32.totalorder %s840_s18, 6   ;;  %s1022_s12 = smov %s782_s13 }
 0x1ce   : > { %s1023_s13 = smov %s786_s14  ;;  %s1024_s14 = smov %s851_s21 }
 0x1cf   : > { %s1025_s15 = smov %s840_s18  ;;  %15 = sbr.rel (!%p13_p3) target bundleno = 3 (0x3), region = 68 }
 0x1d6   :  { %546 = vsyncpa [#allocation3], 1 }
 0x1d7   :  { %548 = vsyncpa [#allocation3 + $0x1], 1 }

// kernel: _lambda_.1
= control target key start
LH: loop header
LB: loop body
LE: loop exit
PB: predicated region body
PF: predicated region fallthrough
CT: control target
= control target key end

     0   :  { %8 = vsyncpa [#allocation3], 0  ;;  %s1016_s0 = inlined_call_operand.vmem [shape: f32[16,2,8,64], index: 0, kind: input, shape index: {}]   ;;  %s1017_s1 = inlined_call_operand.vmem [shape: bf16[2,64,64], index: 1, kind: input, shape index: {}]   ;;  %s1018_s2 = inlined_call_operand.vmem [shape: f32[1,64], index: 2, kind: input, shape index: {}]   ;;  %s1019_s3 = inlined_call_operand.hbm [shape: f32[16,8,64], index: 3, kind: output, shape index: {}]  }
   0x1   :  { %10 = vsyncpa [#allocation3 + $0x1], 0  ;;  %s815_s12 = smov 0   ;;  %s817_s13 = smov 0  }
   0x2   :  { %s819_s14 = smov 0   ;;  %s821_s15 = smov 0  }
   0x3 LB: > { %s836_s16 = sadd.s32 4294967295, %s790_s15   ;;  %s587_s17 = sadd.s32 4294967294, %s790_s15   ;;  %s790_s15 = sphi %s821_s15, %s1025_s15   ;;  %s786_s14 = sphi %s819_s14, %s1024_s14   ;;  %s782_s13 = sphi %s817_s13, %s1023_s13   ;;  %s778_s12 = sphi %s815_s12, %s1022_s12  }
   0x4   : > { %s840_s18 = sadd.s32 1, %s790_s15   ;;  %s91_s19 = sadd.s32 1, %s786_s14 }
   0x5   : > { %s88_s20 = ssub.s32 %s790_s15, %s840_s18  ;;  %p101_p0 = scmp.ne.s32.totalorder %s786_s14, %s782_s13 }
   0x6   : > { %p89_p1 = scmp.eq.s32.totalorder %s88_s20, 0  ;;  %p102_p2 = scmp.eq.s32.totalorder %s836_s16, 3 }
   0x7   : > { %p107_p3 = scmp.ne.s32.totalorder %s782_s13, %s778_s12  ;;  %p108_p4 = scmp.eq.s32.totalorder %s587_s17, 3 }
   0x8   : > { %s851_s21 = scalar_select %p89_p1, %s786_s14, %s91_s19  }
   0x9   : > { %p853_p5 = por %p102_p2, %p101_p0  ;;  %p857_p6 = por %p108_p4, %p107_p3 }
   0xa   : > { %p590_p7 = scmp.ge.s32.totalorder %s790_s15, 1  ;;  %p142_p8 = scmp.lt.s32.totalorder %s790_s15, 5 }
   0xc   : > { %p143_p9 = pnand %p590_p7, %p142_p8 }
   0xd   : > { %s592_s24 = sshll.u32 (!%p143_p9), %s836_s16, 2  ;;  %vm184_vm0 = vcmask (!%p143_p9), 523264   ;;  %v712_v32 = vld [vmem:[%s1017_s1 + $0x20] sm:$0xff] (!%p143_p9)   ;;  %v714_v34 = vld [vmem:[%s1017_s1 + $0x28] sm:$0xff] (!%p143_p9)   ;;  %v716_v36 = vld [vmem:[%s1017_s1 + $0x30] sm:$0xff] (!%p143_p9)   ;;  %s164_s27 = sand.u32 (!%p143_p9), 1, %s782_s13  }
   0xe   : > { %146 = sbr.rel (%p143_p9) target bundleno = 456 (0x1c8), region = 32  ;;  %p168_p10 = scmp.lt.s32.totalorder (!%p143_p9), %s592_s24, 15  ;;  %v713_v33 = vld [vmem:[%s1017_s1] sm:$0xff] (!%p143_p9)   ;;  %643 = vmatprep.subr.bf16.mxu1 (!%p143_p9), %v712_v32  ;;  %v715_v35 = vld [vmem:[%s1017_s1 + $0x8] sm:$0xff] (!%p143_p9)   ;;  %v717_v37 = vld [vmem:[%s1017_s1 + $0x10] sm:$0xff] (!%p143_p9)  }
   0xf   : > { %655 = vmatprep.subr.bf16.mxu0 (!%p143_p9), %v713_v33  ;;  %644 = vmatpush3.bf16.msra.mxu1 (!%p143_p9), %v712_v32  ;;  %v718_v38 = vld [vmem:[%s1017_s1 + $0x38] sm:$0xff] (!%p143_p9)   ;;  %s630_s6 = sshll.u32 (!%p143_p9), %s836_s16, 9  ;;  %s975_s16 = scalar_lea.sflag (!%p143_p9), [#allocation3], %s164_s27 }
  0x10   : > { %656 = vmatpush3.bf16.msra.mxu0 (!%p143_p9), %v713_v33  ;;  %645 = vmatprep.subr.bf16.mxu1 (!%p143_p9), %v714_v34  ;;  %v719_v39 = vld [vmem:[%s1017_s1 + $0x18] sm:$0xff] (!%p143_p9)   ;;  %s968_s9 = scalar_lea.hbm (!%p143_p9), %s1019_s3, %s630_s6  ;;  %s792_s11 = smov (!%p143_p9), [#allocation2]  }
  0x11   : > { %657 = vmatprep.subr.bf16.mxu0 (!%p143_p9), %v715_v35  ;;  %s732_s17 = sshll.u32 (!%p143_p9), %s792_s11, 4  ;;  %s733_s17 = int_to_ptr.vmem [resolvable:$false] %s732_s17 }
  0x12   : > { %s734_s19 = scalar_lea.vmem (!%p143_p9), %s733_s17, 1024 }
  0x13   : > { %646 = vmatpush3.bf16.msra.mxu1 (!%p143_p9), %v714_v34 }
  0x14   : > { %658 = vmatpush3.bf16.msra.mxu0 (!%p143_p9), %v715_v35  ;;  %647 = vmatprep.subr.bf16.mxu1 (!%p143_p9), %v716_v36 }
  0x15   : > { %s1027_s24 = smov (!%p168_p10, %s592_s24), 15  ;;  %659 = vmatprep.subr.bf16.mxu0 %v717_v37 }
  0x16   : > { %s625_s25 = sshll.u32 %s1027_s24, 4 }
  0x17   : > { %s172_s28 = scalar_lea.vmem %s1016_s0, %s625_s25  ;;  %648 = vmatpush3.bf16.msra.mxu1 %v716_v36 }
  0x18   : > { %v867_v0 = vld [vmem:[%s172_s28 + $0x8] sm:$0xff]  ;;  %v869_v1 = vld [vmem:[%s172_s28] sm:$0xff]  ;;  %v871_v2 = vld [vmem:[%s172_s28 + $0x18] sm:$0xff]  ;;  %660 = vmatpush3.bf16.msra.mxu0 %v717_v37  ;;  %649 = vmatprep.subr.bf16.mxu1 %v718_v38 }
  0x19   : > { %v197_v3 = vsel %vm184_vm0, %v867_v0, 0.0  ;;  %v185_v4 = vsel %vm184_vm0, %v869_v1, 0.0  ;;  %v877_v5 = vld [vmem:[%s172_s28 + $0x10] sm:$0xff]  ;;  %v200_v6 = vsel %vm184_vm0, %v871_v2, 0.0  ;;  %v885_v9 = vld [vmem:[%s172_s28 + $0x20] sm:$0xff]  ;;  %v891_v12 = vld [vmem:[%s172_s28 + $0x38] sm:$0xff]  ;;  %v213_v17 = vmul.f32 %v869_v1, %v869_v1  ;;  %661 = vmatprep.subr.bf16.mxu0 %v719_v39 }
  0x1a   : > { %198 = vadd.xlane.f32.xlu1 %v197_v3  ;;  %186 = vadd.xlane.f32.xlu0 %v185_v4  ;;  %v188_v7 = vsel %vm184_vm0, %v877_v5, 0.0  ;;  %v883_v8 = vld [vmem:[%s172_s28 + $0x30] sm:$0xff]  ;;  %v191_v11 = vsel %vm184_vm0, %v885_v9, 0.0  ;;  %v893_v13 = vld [vmem:[%s172_s28 + $0x28] sm:$0xff]  ;;  %v206_v14 = vsel %vm184_vm0, %v891_v12, 0.0  ;;  %v214_v16 = vmul.f32 %v877_v5, %v877_v5  ;;  %s591_s28 = sshll.u32 %s164_s27, 5 }
  0x1b   : > { %v194_v10 = vsel %vm184_vm0, %v883_v8, 0.0  ;;  %v203_v15 = vsel %vm184_vm0, %v893_v13, 0.0  ;;  %v217_v19 = vsel %vm184_vm0, %v213_v17, 0.0  ;;  %v230_v20 = vmul.f32 %v871_v2, %v871_v2  ;;  %650 = vmatpush3.bf16.msra.mxu1 %v718_v38  ;;  %s166_s4 = scalar_lea.vmem [#allocation2], %s591_s28 }
  0x1c   : > { %v220_v18 = vsel %vm184_vm0, %v214_v16, 0.0  ;;  %v229_v21 = vmul.f32 %v867_v0, %v867_v0  ;;  %v216_v24 = vmul.f32 %v883_v8, %v883_v8  ;;  %v215_v25 = vmul.f32 %v885_v9, %v885_v9  ;;  %662 = vmatpush3.bf16.msra.mxu0 %v719_v39  ;;  %s525_s5 = sshll.u32 %s166_s4, 4  ;;  %s970_s5 = int_to_ptr.vmem [resolvable:$true] %s525_s5 }
  0x1d   : > { %v236_v22 = vsel %vm184_vm0, %v230_v20, 0.0  ;;  %v232_v28 = vmul.f32 %v891_v12, %v891_v12  ;;  %v231_v29 = vmul.f32 %v893_v13, %v893_v13  ;;  %s728_s10 = scalar_lea.vmem %s970_s5, 512  ;;  %p735_p0 = scmp.lt.s32.totalorder %s970_s5, %s733_s17 }
  0x1e   : > { %201 = vadd.xlane.f32.xlu1 %v200_v6  ;;  %189 = vadd.xlane.f32.xlu0 %v188_v7  ;;  %v233_v23 = vsel %vm184_vm0, %v229_v21, 0.0  ;;  %v226_v26 = vsel %vm184_vm0, %v216_v24, 0.0  ;;  %v223_v27 = vsel %vm184_vm0, %v215_v25, 0.0  ;;  %p729_p11 = scmp.ne.s32.totalorder %s970_s5, %s728_s10  ;;  %p736_p1 = scmp.lt.s32.totalorder %s734_s19, %s728_s10 }
  0x1f   : > { %v242_v30 = vsel %vm184_vm0, %v232_v28, 0.0  ;;  %v239_v31 = vsel %vm184_vm0, %v231_v29, 0.0 }
  0x20   : > { %p730_p12 = pnand %p729_p11, %p853_p5  ;;  %p737_p2 = por %p736_p1, %p735_p0 }
  0x22   : > { %195 = vadd.xlane.f32.xlu1 %v194_v10  ;;  %192 = vadd.xlane.f32.xlu0 %v191_v11  ;;  %p731_p13 = pneg %p730_p12 }
  0x24   : > { %p738_p3 = pnand %p737_p2, %p731_p13 }
  0x26   : > { %207 = vadd.xlane.f32.xlu1 %v206_v14  ;;  %204 = vadd.xlane.f32.xlu0 %v203_v15 }
  0x2a   : > { %221 = vadd.xlane.f32.xlu1 %v220_v18  ;;  %218 = vadd.xlane.f32.xlu0 %v217_v19 }
  0x2e   : > { %237 = vadd.xlane.f32.xlu1 %v236_v22  ;;  %234 = vadd.xlane.f32.xlu0 %v233_v23 }
  0x32   : > { %227 = vadd.xlane.f32.xlu1 %v226_v26  ;;  %224 = vadd.xlane.f32.xlu0 %v223_v27 }
  0x36   : > { %243 = vadd.xlane.f32.xlu1 %v242_v30  ;;  %240 = vadd.xlane.f32.xlu0 %v239_v31 }
  0xa7   : > { %v199_v40 = vpop.xlane.xlu1 %198  ;;  %v187_v41 = vpop.xlane.xlu0 %186 }
  0xa8   : > { %v209_v48 = vadd.f32 %v199_v40, %v187_v41 }
  0xaa   : > { %v249_v52 = vmul.f32 0.0078125, %v209_v48 }
  0xab   : > { %v202_v42 = vpop.xlane.xlu1 %201  ;;  %v190_v43 = vpop.xlane.xlu0 %189 }
  0xac   : > { %v210_v49 = vadd.f32 %v202_v42, %v190_v43  ;;  %v257_v59 = vmul.f32 %v249_v52, %v249_v52  ;;  %v289_v35 = vsub.f32 %v867_v0, %v249_v52  ;;  %v277_v36 = vsub.f32 %v869_v1, %v249_v52 }
  0xae   : > { %v250_v53 = vmul.f32 0.0078125, %v210_v49 }
  0xaf   : > { %v196_v44 = vpop.xlane.xlu1 %195  ;;  %v193_v45 = vpop.xlane.xlu0 %192 }
  0xb0   : > { %v258_v62 = vmul.f32 %v250_v53, %v250_v53  ;;  %v290_v32 = vsub.f32 %v871_v2, %v250_v53  ;;  %v278_v33 = vsub.f32 %v877_v5, %v250_v53 }
  0xb3   : > { %v208_v46 = vpop.xlane.xlu1 %207  ;;  %v205_v47 = vpop.xlane.xlu0 %204 }
  0xb4   : > { %v212_v58 = vadd.f32 %v208_v46, %v196_v44  ;;  %v211_v60 = vadd.f32 %v205_v47, %v193_v45 }
  0xb6   : > { %v252_v10 = vmul.f32 0.0078125, %v212_v58  ;;  %v251_v11 = vmul.f32 0.0078125, %v211_v60 }
  0xb7   : > { %v222_v50 = vpop.xlane.xlu1 %221  ;;  %v219_v51 = vpop.xlane.xlu0 %218 }
  0xb8   : > { %v260_v22 = vmul.f32 %v252_v10, %v252_v10  ;;  %v259_v24 = vmul.f32 %v251_v11, %v251_v11  ;;  %v280_v2 = vsub.f32 %v883_v8, %v252_v10  ;;  %v292_v5 = vsub.f32 %v891_v12, %v252_v10 }
  0xb9   : > { %v279_v0 = vsub.f32 %v885_v9, %v251_v11  ;;  %v291_v1 = vsub.f32 %v893_v13, %v251_v11  ;;  %v619_v9 = vld [vmem:[%s1018_s2] ss:$0 sm:$0xff] }
  0xbb   : > { %v238_v54 = vpop.xlane.xlu1 %237  ;;  %v235_v55 = vpop.xlane.xlu0 %234 }
  0xbc   : > { %v246_v56 = vadd.f32 %v238_v54, %v222_v50  ;;  %v245_v57 = vadd.f32 %v235_v55, %v219_v51 }
  0xbe   : > { %v254_v61 = vmul.f32 0.0078125, %v246_v56  ;;  %v253_v63 = vmul.f32 0.0078125, %v245_v57 }
  0xbf   : > { %v228_v3 = vpop.xlane.xlu1 %227  ;;  %v225_v4 = vpop.xlane.xlu0 %224 }
  0xc0   : > { %v262_v6 = vsub.f32 %v254_v61, %v258_v62  ;;  %v261_v7 = vsub.f32 %v253_v63, %v257_v59 }
  0xc2   : > { %v266_v14 = vmax.f32 %v262_v6, 0.0  ;;  %v265_v15 = vmax.f32 %v261_v7, 0.0 }
  0xc3   : > { %v244_v16 = vpop.xlane.xlu1 %243  ;;  %v241_v17 = vpop.xlane.xlu0 %240 }
  0xc4   : > { %v270_v18 = vadd.f32 1e-05, %v266_v14  ;;  %v269_v19 = vadd.f32 1e-05, %v265_v15  ;;  %v248_v20 = vadd.f32 %v244_v16, %v228_v3  ;;  %v247_v21 = vadd.f32 %v241_v17, %v225_v4 }
  0xc6   : > { %720 = vrsqrt.f32 %v270_v18  ;;  %v256_v23 = vmul.f32 0.0078125, %v248_v20  ;;  %v255_v25 = vmul.f32 0.0078125, %v247_v21 }
  0xc7   : > { %722 = vrsqrt.f32 %v269_v19 }
  0xc8   : > { %v264_v26 = vsub.f32 %v256_v23, %v260_v22  ;;  %v263_v27 = vsub.f32 %v255_v25, %v259_v24 }
  0xca   : > { %v268_v28 = vmax.f32 %v264_v26, 0.0  ;;  %v267_v29 = vmax.f32 %v263_v27, 0.0 }
  0xcc   : > { %v272_v30 = vadd.f32 1e-05, %v268_v28  ;;  %v271_v31 = vadd.f32 1e-05, %v267_v29 }
  0xce   : > { %724 = vrsqrt.f32 %v272_v30 }
  0xcf   : > { %726 = vrsqrt.f32 %v271_v31 }
  0xd0   : > { %v721_v34 = vpop.eup %720 }
  0xd1   : > { %v723_v37 = vpop.eup %722  ;;  %v294_v38 = vmul.f32 %v721_v34, %v290_v32  ;;  %v282_v39 = vmul.f32 %v721_v34, %v278_v33 }
  0xd2   : > { %v293_v40 = vmul.f32 %v723_v37, %v289_v35  ;;  %v281_v41 = vmul.f32 %v723_v37, %v277_v36 }
  0xd4   : > { %v626_v42 = vpack.c.bf16 %v294_v38, %v293_v40  ;;  %v628_v43 = vpack.c.bf16 %v282_v39, %v281_v41 }
  0xd6   : > { %651 = vmatprep.mubr.msk.bf16.mxu1 %vm184_vm0, %v626_v42  ;;  %663 = vmatprep.mubr.msk.bf16.mxu0 %vm184_vm0, %v628_v43 }
  0xd8   : > { %v725_v44 = vpop.eup %724 }
  0xd9   : > { %v727_v45 = vpop.eup %726  ;;  %v296_v46 = vmul.f32 %v725_v44, %v292_v5  ;;  %v284_v47 = vmul.f32 %v725_v44, %v280_v2 }
  0xda   : > { %v295_v48 = vmul.f32 %v727_v45, %v291_v1  ;;  %v283_v49 = vmul.f32 %v727_v45, %v279_v0 }
  0xdc   : > { %v627_v50 = vpack.c.bf16 %v296_v46, %v295_v48  ;;  %v629_v51 = vpack.c.bf16 %v284_v47, %v283_v49 }
  0xde   : > { %652 = vmatmul.mubr.msk.bf16.vlgmr.msra.gmra.mrb[0].mxu1 %vm184_vm0, %v627_v50  ;;  %664 = vmatmul.mubr.msk.bf16.vlgmr.msra.gmra.mrb[0].mxu0 %vm184_vm0, %v629_v51 }
 0x1b1   : > { %v653_v8 = vpop.f32.mrb[0].mxu1  ;;  %v665_v12 = vpop.f32.mrb[0].mxu0 }
 0x1b2   : > { %v490_v13 = vadd.f32 %v665_v12, %v653_v8  ;;  %v392_v52 = vpop.f32.mrb[1].mxu1  ;;  %v481_v53 = vpop.f32.mrb[1].mxu0 }
 0x1b3   : > { %v482_v54 = vadd.f32 %v481_v53, %v392_v52  ;;  %v654_v55 = vpop.f32.mrb[2].mxu1  ;;  %v666_v56 = vpop.f32.mrb[2].mxu0 }
 0x1b4   : > { %v505_v57 = vadd.f32 %v619_v9, %v490_v13  ;;  %v493_v58 = vadd.f32 %v666_v56, %v654_v55  ;;  %v395_v59 = vpop.f32.mrb[3].mxu1  ;;  %v484_v60 = vpop.f32.mrb[3].mxu0 }
 0x1b5   : > { %v503_v61 = vadd.f32 %v619_v9, %v482_v54  ;;  %v485_v62 = vadd.f32 %v484_v60, %v395_v59 }
 0x1b6   : > { %509 = vst.msk [vmem:[%s166_s4 + $0x10] sm:$0xff] %vm184_vm0, %v505_v57  ;;  %v506_v63 = vadd.f32 %v619_v9, %v493_v58 }
 0x1b7   : > { %507 = vst.msk [vmem:[%s166_s4] sm:$0xff] %vm184_vm0, %v503_v61  ;;  %v504_v3 = vadd.f32 %v619_v9, %v485_v62 }
 0x1b8   : > { %510 = vst.msk [vmem:[%s166_s4 + $0x18] sm:$0xff] %vm184_vm0, %v506_v63 }
 0x1b9   : > { %508 = vst.msk [vmem:[%s166_s4 + $0x8] sm:$0xff] %vm184_vm0, %v504_v3 }
 0x1ba   : > { %741 = shalt.err (!%p738_p3)
}
 0x1bb   : > { %s742_s20 = scalar_lea.hbm %s968_s9, 512  ;;  %s746_s26 = scalar_lea.hbm %s1019_s3, 2048 }
 0x1bc   : > { %p743_p4 = scmp.ne.s32.totalorder %s968_s9, %s742_s20  ;;  %p747_p9 = scmp.lt.u32.totalorder %s968_s9, %s1019_s3 }
 0x1bd   : > { %p748_p10 = scmp.lt.u32.totalorder %s746_s26, %s742_s20  ;;  %p750_p12 = scmp.lt.u32.totalorder %s742_s20, %s968_s9 }
 0x1be   : > { %p744_p7 = pnand %p743_p4, %p853_p5 }
 0x1bf   : > { %p749_p11 = por %p748_p10, %p747_p9 }
 0x1c0   : > { %p745_p8 = pneg %p744_p7 }
 0x1c1   : > { %p751_p13 = por %p750_p12, %p749_p11 }
 0x1c3   : > { %p752_p0 = pnand %p751_p13, %p745_p8 }
 0x1c5   : > { %755 = shalt.err (!%p752_p0)
}
 0x1c6   : > { %s793_s29 = smov 128   ;;  %s794_s30 = smov 8  }
 0x1c7   : > { %671 = dma.vmem_to_hbm [thread:$0]  (%p853_p5), %s970_s5, 512, %s968_s9, %s975_s16, %s793_s29, %s793_s29, %s794_s30  }
 0x1c8 PF: > { %p677_p1 = scmp.ge.s32.totalorder %s790_s15, 2  ;;  %s540_s4 = sand.u32 1, %s778_s12  }
 0x1c9   : > { %s541_s6 = scalar_lea.sflag [#allocation3], %s540_s4 }
 0x1ca   : > { %p674_p2 = pnand %p677_p1, %p857_p6 }
 0x1cc   : > { %773 = dma.done.wait (!%p674_p2), %s541_s6, 512  }
 0x1cd   : > { %775 = vsyncadd (!%p674_p2), %s541_s6, 4294966784  ;;  %p13_p3 = scmp.ge.s32.totalorder %s840_s18, 6   ;;  %s1022_s12 = smov %s782_s13 }
 0x1ce   : > { %s1023_s13 = smov %s786_s14  ;;  %s1024_s14 = smov %s851_s21 }
 0x1cf   : > { %s1025_s15 = smov %s840_s18  ;;  %15 = sbr.rel (!%p13_p3) target bundleno = 3 (0x3), region = 68 }
 0x1d6   :  { %546 = vsyncpa [#allocation3], 1 }
 0x1d7   :  { %548 = vsyncpa [#allocation3 + $0x1], 1 }

</bundles_post_ra>
